<compile_context>
chip_gen: v6e
topology: v6e:2x2x1
jax: 0.10.0
libtpu: 0.0.40
codegen_flags: <defaults>
</compile_context>

<pallas_src>
import functools

import jax
import jax.numpy as jnp
from jax import lax
from jax.experimental import pallas as pl
from jax.experimental.pallas import tpu as pltpu


# ---------------------------------------------------------------------------
# Fused kernel: gather -> idf softmax -> bilinear attention -> softmax ->
#               weighted sum -> encoder -> softmax -> decoder, plus noise mean.
# Processes a whole batch tile (Bt sentences, Bt*N noise groups) per grid step.
# ---------------------------------------------------------------------------
def _fused_forward_kernel(Bt, L, N, Ln,
                          tok_ref, ntok_ref, wemb_ref, widf_t_ref, wb_t_ref,
                          wenc_t_ref, wdec_t_ref, bb_ref,
                          attsent_ref, trans_ref, nmean_ref):
    V, D = wemb_ref.shape

    # ---- Embs: fused embedding gather (one-hot @ table on the MXU) ----------
    tok = tok_ref[...]                                               # (Bt*L, 1) i32
    oh = (tok == lax.broadcasted_iota(jnp.int32, (Bt * L, V), 1)
          ).astype(jnp.float32)                                      # (Bt*L, V)
    ew_flat = jnp.dot(oh, wemb_ref[...],
                      preferred_element_type=jnp.float32)            # (Bt*L, D)
    idf_flat = jnp.sum(oh * widf_t_ref[...], axis=1, keepdims=True)  # (Bt*L, 1)

    ew3 = ew_flat.reshape(Bt, L, D)     # L==8 sublanes per sentence, D on lanes
    idf = idf_flat.reshape(Bt, L, 1)

    # ---- idf softmax over the sequence axis (sublane reduce) ----------------
    idf = idf - jnp.max(idf, axis=1, keepdims=True)
    e_idf = jnp.exp(idf)
    idf_w = e_idf / jnp.sum(e_idf, axis=1, keepdims=True)            # (Bt, L, 1)

    ew = ew3 * idf_w                                                 # (Bt, L, D)
    emb_sent = jnp.sum(ew, axis=1)                                   # (Bt, D)

    # ---- bilinear attention:  score[l] = ew[l] . (Wb @ sent) + b ------------
    v = jnp.dot(emb_sent, wb_t_ref[...],
                preferred_element_type=jnp.float32)                  # (Bt, D)
    score = jnp.sum(ew * v[:, None, :], axis=2, keepdims=True) + bb_ref[0]

    score = score - jnp.max(score, axis=1, keepdims=True)
    e_s = jnp.exp(score)
    alpha = e_s / jnp.sum(e_s, axis=1, keepdims=True)                # (Bt, L, 1)
    attsent = jnp.sum(alpha * ew, axis=1)                            # (Bt, D)

    # ---- encoder -> softmax -> decoder (batched over the whole tile) --------
    topic = jnp.dot(attsent, wenc_t_ref[...],
                    preferred_element_type=jnp.float32)              # (Bt, K)
    topic = topic - jnp.max(topic, axis=-1, keepdims=True)
    e_t = jnp.exp(topic)
    topic_class = e_t / jnp.sum(e_t, axis=-1, keepdims=True)
    trans = jnp.dot(topic_class, wdec_t_ref[...],
                    preferred_element_type=jnp.float32)              # (Bt, D)

    attsent_ref[...] = attsent                                       # dense 2-D slab
    trans_ref[...] = trans

    # ---- noise features: mean over Ln folded into the one-hot gather --------
    ntok = ntok_ref[...]                                             # (Bt*N*Ln, 1)
    oh_n = (ntok == lax.broadcasted_iota(jnp.int32, (Bt * N * Ln, V), 1)
            ).astype(jnp.float32)
    probs_n = jnp.mean(oh_n.reshape(Bt * N, Ln, V), axis=1)          # (Bt*N, V)
    nmean_ref[...] = jnp.dot(probs_n, wemb_ref[...],
                             preferred_element_type=jnp.float32)     # (Bt*N, D)


# ---------------------------------------------------------------------------
# Wrapper: only layout plumbing (reshapes / weight transposes) happens here.
# ---------------------------------------------------------------------------
def autoencoder_forward(params, inputs, noises, *, batch_tile=None):
    W_emb, W_idf, Wb, bb, W_enc, W_dec = params
    B, L = inputs.shape
    _, N, Ln = noises.shape
    V, D = W_emb.shape
    K = W_enc.shape[0]

    Bt = B if batch_tile is None else min(batch_tile, B)
    assert B % Bt == 0, "batch_tile must divide batch"
    grid = (B // Bt,)

    tok = inputs.reshape(B * L, 1).astype(jnp.int32)
    ntok = noises.reshape(B * N * Ln, 1).astype(jnp.int32)
    wemb = W_emb.astype(jnp.float32)
    widf_t = W_idf.astype(jnp.float32).T          # (1, V)
    wb_t = Wb.astype(jnp.float32).T               # (D, D): v = sent @ Wb^T
    wenc_t = W_enc.astype(jnp.float32).T          # (D, K)
    wdec_t = W_dec.astype(jnp.float32).T          # (K, D)
    bb1 = bb.reshape(1).astype(jnp.float32)       # scalar -> SMEM

    kernel = functools.partial(_fused_forward_kernel, Bt, L, N, Ln)

    attsent, trans, nmean = pl.pallas_call(
        kernel,
        out_shape=(jax.ShapeDtypeStruct((B, D), jnp.float32),
                   jax.ShapeDtypeStruct((B, D), jnp.float32),
                   jax.ShapeDtypeStruct((B * N, D), jnp.float32)),
        grid=grid,
        in_specs=[
            pl.BlockSpec((Bt * L, 1), lambda i: (i, 0)),        # sentence tokens
            pl.BlockSpec((Bt * N * Ln, 1), lambda i: (i, 0)),   # noise tokens
            pl.BlockSpec((V, D), lambda i: (0, 0)),             # W_emb
            pl.BlockSpec((1, V), lambda i: (0, 0)),             # W_idf^T
            pl.BlockSpec((D, D), lambda i: (0, 0)),             # Wb^T
            pl.BlockSpec((D, K), lambda i: (0, 0)),             # W_enc^T
            pl.BlockSpec((K, D), lambda i: (0, 0)),             # W_dec^T
            pl.BlockSpec(memory_space=pltpu.MemorySpace.SMEM),  # bilinear bias
        ],
        out_specs=(
            pl.BlockSpec((Bt, D), lambda i: (i, 0)),
            pl.BlockSpec((Bt, D), lambda i: (i, 0)),
            pl.BlockSpec((Bt * N, D), lambda i: (i, 0)),
        ),
        compiler_params=pltpu.CompilerParams(
            dimension_semantics=("parallel",)),                 # v7x: 2 TCs
    )(tok, ntok, wemb, widf_t, wb_t, wenc_t, wdec_t, bb1)

    return attsent, trans, nmean.reshape(B, N, D)


# ---------------------------------------------------------------------------
# Pure-JAX reference (for correctness check)
# ---------------------------------------------------------------------------
def reference_forward(params, inputs, noises):
    W_emb, W_idf, Wb, bb, W_enc, W_dec = params
    emb_word = W_emb[inputs]
    emb_idf = jax.nn.softmax(W_idf[inputs], axis=-2)
    ew = emb_word * emb_idf
    emb_sent = jnp.sum(ew, axis=1, keepdims=True)               # (B,1,D)
    sent_ex = jnp.broadcast_to(emb_sent, ew.shape)
    score = jnp.einsum('bli,ij,blj->bl', ew, Wb, sent_ex)[..., None] + bb
    alpha = jax.nn.softmax(score, axis=1)
    emb_attsent = jnp.sum(alpha * ew, axis=1)                   # (B,D)
    topic = emb_attsent @ W_enc.T
    topic_class = jax.nn.softmax(topic, axis=-1)
    trans_sent = topic_class @ W_dec.T
    emb_noise = jnp.mean(W_emb[noises], axis=2)
    return emb_attsent, trans_sent, emb_noise


if __name__ == "__main__":
    # HPs: emb_size=16, emb_dim=32, pre_embs=None, emb_drop_rate=0.0,
    #      emb_zero_padding=False, grad_flag=True, nn_out_dim=16
    emb_size, emb_dim, nn_out_dim = 16, 32, 16
    B, L = 2, 8          # sentence batch / length
    N, Ln = 4, 8         # noise groups / noise length

    key = jax.random.PRNGKey(0)
    k_emb, k_idf, k_bw, k_bb, k_enc, k_dec, k_in, k_no = jax.random.split(key, 8)

    scale = float(jnp.sqrt(3.0 / emb_dim))
    W_emb = jax.random.uniform(k_emb, (emb_size, emb_dim), jnp.float32, -scale, scale)
    scale_idf = float(jnp.sqrt(3.0 / 1.0))
    W_idf = jax.random.uniform(k_idf, (emb_size, 1), jnp.float32, -scale_idf, scale_idf)
    # nn.Bilinear(D, D, 1): weight (1, D, D) -> stored squeezed (D, D); bias (1,)
    Wb = jax.random.uniform(k_bw, (emb_dim, emb_dim), jnp.float32, -0.1, 0.1)
    bb = jax.random.uniform(k_bb, (1,), jnp.float32, -0.1, 0.1)
    # nn.Linear(D, K, bias=False): weight (K, D); nn.Linear(K, D, bias=False): weight (D, K)
    W_enc = jax.random.uniform(k_enc, (nn_out_dim, emb_dim), jnp.float32, -0.1, 0.1)
    W_dec = jax.random.uniform(k_dec, (emb_dim, nn_out_dim), jnp.float32, -0.1, 0.1)
    params = (W_emb, W_idf, Wb, bb, W_enc, W_dec)

    inputs = jax.random.randint(k_in, (B, L), 0, emb_size)
    noises = jax.random.randint(k_no, (B, N, Ln), 0, emb_size)

    out = autoencoder_forward(params, inputs, noises)
    out = jax.block_until_ready(out)
    ref = reference_forward(params, inputs, noises)

    for got, want in zip(out, ref):
        assert got.shape == want.shape and got.dtype == want.dtype
        assert jnp.allclose(got, want, atol=1e-5, rtol=1e-4), "mismatch vs reference"

    print("KERNEL_OK")
</pallas_src>

<mosaic_0001>
module attributes {stable_mosaic.version = 11 : i64} {
  func.func @_fused_forward_kernel(%arg0: i32, %arg1: memref<16x1xi32, #tpu.memory_space<vmem>>, %arg2: memref<64x1xi32, #tpu.memory_space<vmem>>, %arg3: memref<16x32xf32, #tpu.memory_space<vmem>>, %arg4: memref<1x16xf32, #tpu.memory_space<vmem>>, %arg5: memref<32x32xf32, #tpu.memory_space<vmem>>, %arg6: memref<32x16xf32, #tpu.memory_space<vmem>>, %arg7: memref<16x32xf32, #tpu.memory_space<vmem>>, %arg8: memref<1xf32, #tpu.memory_space<smem>>, %arg9: memref<2x32xf32, #tpu.memory_space<vmem>>, %arg10: memref<2x32xf32, #tpu.memory_space<vmem>>, %arg11: memref<8x32xf32, #tpu.memory_space<vmem>>) attributes {dimension_semantics = [#tpu.dimension_semantics<parallel>], iteration_bounds = array<i64: 1>, scalar_prefetch = 0 : i64, scratch_operands = 0 : i64, tpu.core_type = #tpu.core_type<tc>, window_params = [{transform_indices = @transform_0, window_bounds = array<i64: 16, 1>}, {transform_indices = @transform_1, window_bounds = array<i64: 64, 1>}, {pipeline_mode = #tpu.pipeline_mode<synchronous>, transform_indices = @transform_2, window_bounds = array<i64: 16, 32>}, {pipeline_mode = #tpu.pipeline_mode<synchronous>, transform_indices = @transform_3, window_bounds = array<i64: 1, 16>}, {pipeline_mode = #tpu.pipeline_mode<synchronous>, transform_indices = @transform_4, window_bounds = array<i64: 32, 32>}, {pipeline_mode = #tpu.pipeline_mode<synchronous>, transform_indices = @transform_5, window_bounds = array<i64: 32, 16>}, {pipeline_mode = #tpu.pipeline_mode<synchronous>, transform_indices = @transform_6, window_bounds = array<i64: 16, 32>}, {transform_indices = @transform_7, window_bounds = array<i64: 1>}, {transform_indices = @transform_8, window_bounds = array<i64: 2, 32>}, {transform_indices = @transform_9, window_bounds = array<i64: 2, 32>}, {transform_indices = @transform_10, window_bounds = array<i64: 8, 32>}]} {
    %c0 = arith.constant 0 : index
    %c0_0 = arith.constant 0 : index
    %0 = vector.load %arg1[%c0, %c0_0] : memref<16x1xi32, #tpu.memory_space<vmem>>, vector<16x1xi32>
    %1 = tpu.iota {dimensions = array<i32: 1>} : vector<16x16xi32>
    %2 = vector.broadcast %0 : vector<16x1xi32> to vector<16x16xi32>
    %3 = arith.cmpi eq, %2, %1 : vector<16x16xi32>
    %4 = arith.extui %3 : vector<16x16xi1> to vector<16x16xi32>
    %5 = arith.sitofp %4 : vector<16x16xi32> to vector<16x16xf32>
    %c0_1 = arith.constant 0 : index
    %c0_2 = arith.constant 0 : index
    %6 = vector.load %arg3[%c0_1, %c0_2] : memref<16x32xf32, #tpu.memory_space<vmem>>, vector<16x32xf32>
    %cst = arith.constant dense<0.000000e+00> : vector<16x32xf32>
    %7 = tpu.matmul %5, %6, %cst {dimension_numbers = #tpu.dot_dimension_numbers<[1], [0], [0], [1], [0, 0, 1, 1], [], []>} : vector<16x16xf32>, vector<16x32xf32>, vector<16x32xf32> -> vector<16x32xf32>
    %c0_3 = arith.constant 0 : index
    %c0_4 = arith.constant 0 : index
    %8 = vector.load %arg4[%c0_3, %c0_4] : memref<1x16xf32, #tpu.memory_space<vmem>>, vector<1x16xf32>
    %9 = vector.broadcast %8 : vector<1x16xf32> to vector<16x16xf32>
    %10 = arith.mulf %5, %9 : vector<16x16xf32>
    %cst_5 = arith.constant dense<0.000000e+00> : vector<16xf32>
    %11 = vector.multi_reduction <add>, %10, %cst_5 [1] : vector<16x16xf32> to vector<16xf32>
    %12 = vector.shape_cast %11 : vector<16xf32> to vector<16x1xf32>
    %13 = vector.shape_cast %7 : vector<16x32xf32> to vector<2x8x32xf32>
    %14 = vector.shape_cast %12 : vector<16x1xf32> to vector<2x8x1xf32>
    %cst_6 = arith.constant dense<0xFF800000> : vector<2x1xf32>
    %15 = vector.multi_reduction <maximumf>, %14, %cst_6 [1] : vector<2x8x1xf32> to vector<2x1xf32>
    %16 = vector.shape_cast %15 : vector<2x1xf32> to vector<2x1x1xf32>
    %17 = vector.broadcast %16 : vector<2x1x1xf32> to vector<2x8x1xf32>
    %18 = arith.subf %14, %17 : vector<2x8x1xf32>
    %19 = math.exp %18 : vector<2x8x1xf32>
    %cst_7 = arith.constant dense<0.000000e+00> : vector<2x1xf32>
    %20 = vector.multi_reduction <add>, %19, %cst_7 [1] : vector<2x8x1xf32> to vector<2x1xf32>
    %21 = vector.shape_cast %20 : vector<2x1xf32> to vector<2x1x1xf32>
    %22 = vector.broadcast %21 : vector<2x1x1xf32> to vector<2x8x1xf32>
    %23 = arith.divf %19, %22 : vector<2x8x1xf32>
    %24 = vector.broadcast %23 : vector<2x8x1xf32> to vector<2x8x32xf32>
    %25 = arith.mulf %13, %24 : vector<2x8x32xf32>
    %cst_8 = arith.constant dense<0.000000e+00> : vector<2x32xf32>
    %26 = vector.multi_reduction <add>, %25, %cst_8 [1] : vector<2x8x32xf32> to vector<2x32xf32>
    %c0_9 = arith.constant 0 : index
    %c0_10 = arith.constant 0 : index
    %27 = vector.load %arg5[%c0_9, %c0_10] : memref<32x32xf32, #tpu.memory_space<vmem>>, vector<32x32xf32>
    %cst_11 = arith.constant dense<0.000000e+00> : vector<2x32xf32>
    %28 = tpu.matmul %26, %27, %cst_11 {dimension_numbers = #tpu.dot_dimension_numbers<[1], [0], [0], [1], [0, 0, 1, 1], [], []>} : vector<2x32xf32>, vector<32x32xf32>, vector<2x32xf32> -> vector<2x32xf32>
    %29 = vector.shape_cast %28 : vector<2x32xf32> to vector<2x1x32xf32>
    %30 = vector.broadcast %29 : vector<2x1x32xf32> to vector<2x8x32xf32>
    %31 = arith.mulf %25, %30 : vector<2x8x32xf32>
    %cst_12 = arith.constant dense<0.000000e+00> : vector<2x8xf32>
    %32 = vector.multi_reduction <add>, %31, %cst_12 [2] : vector<2x8x32xf32> to vector<2x8xf32>
    %33 = vector.shape_cast %32 : vector<2x8xf32> to vector<2x8x1xf32>
    %c0_13 = arith.constant 0 : index
    %34 = memref.load %arg8[%c0_13] : memref<1xf32, #tpu.memory_space<smem>>
    %35 = vector.broadcast %34 : f32 to vector<2x8x1xf32>
    %36 = arith.addf %33, %35 : vector<2x8x1xf32>
    %cst_14 = arith.constant dense<0xFF800000> : vector<2x1xf32>
    %37 = vector.multi_reduction <maximumf>, %36, %cst_14 [1] : vector<2x8x1xf32> to vector<2x1xf32>
    %38 = vector.shape_cast %37 : vector<2x1xf32> to vector<2x1x1xf32>
    %39 = vector.broadcast %38 : vector<2x1x1xf32> to vector<2x8x1xf32>
    %40 = arith.subf %36, %39 : vector<2x8x1xf32>
    %41 = math.exp %40 : vector<2x8x1xf32>
    %cst_15 = arith.constant dense<0.000000e+00> : vector<2x1xf32>
    %42 = vector.multi_reduction <add>, %41, %cst_15 [1] : vector<2x8x1xf32> to vector<2x1xf32>
    %43 = vector.shape_cast %42 : vector<2x1xf32> to vector<2x1x1xf32>
    %44 = vector.broadcast %43 : vector<2x1x1xf32> to vector<2x8x1xf32>
    %45 = arith.divf %41, %44 : vector<2x8x1xf32>
    %46 = vector.broadcast %45 : vector<2x8x1xf32> to vector<2x8x32xf32>
    %47 = arith.mulf %46, %25 : vector<2x8x32xf32>
    %cst_16 = arith.constant dense<0.000000e+00> : vector<2x32xf32>
    %48 = vector.multi_reduction <add>, %47, %cst_16 [1] : vector<2x8x32xf32> to vector<2x32xf32>
    %c0_17 = arith.constant 0 : index
    %c0_18 = arith.constant 0 : index
    %49 = vector.load %arg6[%c0_17, %c0_18] : memref<32x16xf32, #tpu.memory_space<vmem>>, vector<32x16xf32>
    %cst_19 = arith.constant dense<0.000000e+00> : vector<2x16xf32>
    %50 = tpu.matmul %48, %49, %cst_19 {dimension_numbers = #tpu.dot_dimension_numbers<[1], [0], [0], [1], [0, 0, 1, 1], [], []>} : vector<2x32xf32>, vector<32x16xf32>, vector<2x16xf32> -> vector<2x16xf32>
    %cst_20 = arith.constant dense<0xFF800000> : vector<2xf32>
    %51 = vector.multi_reduction <maximumf>, %50, %cst_20 [1] : vector<2x16xf32> to vector<2xf32>
    %52 = vector.shape_cast %51 : vector<2xf32> to vector<2x1xf32>
    %53 = vector.broadcast %52 : vector<2x1xf32> to vector<2x16xf32>
    %54 = arith.subf %50, %53 : vector<2x16xf32>
    %55 = math.exp %54 : vector<2x16xf32>
    %cst_21 = arith.constant dense<0.000000e+00> : vector<2xf32>
    %56 = vector.multi_reduction <add>, %55, %cst_21 [1] : vector<2x16xf32> to vector<2xf32>
    %57 = vector.shape_cast %56 : vector<2xf32> to vector<2x1xf32>
    %58 = vector.broadcast %57 : vector<2x1xf32> to vector<2x16xf32>
    %59 = arith.divf %55, %58 : vector<2x16xf32>
    %c0_22 = arith.constant 0 : index
    %c0_23 = arith.constant 0 : index
    %60 = vector.load %arg7[%c0_22, %c0_23] : memref<16x32xf32, #tpu.memory_space<vmem>>, vector<16x32xf32>
    %cst_24 = arith.constant dense<0.000000e+00> : vector<2x32xf32>
    %61 = tpu.matmul %59, %60, %cst_24 {dimension_numbers = #tpu.dot_dimension_numbers<[1], [0], [0], [1], [0, 0, 1, 1], [], []>} : vector<2x16xf32>, vector<16x32xf32>, vector<2x32xf32> -> vector<2x32xf32>
    %c0_25 = arith.constant 0 : index
    %c0_26 = arith.constant 0 : index
    %62 = vector.load %arg9[%c0_25, %c0_26] : memref<2x32xf32, #tpu.memory_space<vmem>>, vector<2x32xf32>
    tpu.vector_store %arg9[%c0_25, %c0_26], %48 {strides = array<i32>} : memref<2x32xf32, #tpu.memory_space<vmem>>, vector<2x32xf32>,
    %c0_27 = arith.constant 0 : index
    %c0_28 = arith.constant 0 : index
    %63 = vector.load %arg10[%c0_27, %c0_28] : memref<2x32xf32, #tpu.memory_space<vmem>>, vector<2x32xf32>
    tpu.vector_store %arg10[%c0_27, %c0_28], %61 {strides = array<i32>} : memref<2x32xf32, #tpu.memory_space<vmem>>, vector<2x32xf32>,
    %c0_29 = arith.constant 0 : index
    %c0_30 = arith.constant 0 : index
    %64 = vector.load %arg2[%c0_29, %c0_30] : memref<64x1xi32, #tpu.memory_space<vmem>>, vector<64x1xi32>
    %65 = tpu.iota {dimensions = array<i32: 1>} : vector<64x16xi32>
    %66 = vector.broadcast %64 : vector<64x1xi32> to vector<64x16xi32>
    %67 = arith.cmpi eq, %66, %65 : vector<64x16xi32>
    %68 = arith.extui %67 : vector<64x16xi1> to vector<64x16xi32>
    %69 = arith.sitofp %68 : vector<64x16xi32> to vector<64x16xf32>
    %70 = vector.shape_cast %69 : vector<64x16xf32> to vector<8x8x16xf32>
    %cst_31 = arith.constant dense<0.000000e+00> : vector<8x16xf32>
    %71 = vector.multi_reduction <add>, %70, %cst_31 [1] : vector<8x8x16xf32> to vector<8x16xf32>
    %cst_32 = arith.constant 8.000000e+00 : f32
    %72 = vector.broadcast %cst_32 : f32 to vector<8x16xf32>
    %73 = arith.divf %71, %72 : vector<8x16xf32>
    %c0_33 = arith.constant 0 : index
    %c0_34 = arith.constant 0 : index
    %74 = vector.load %arg3[%c0_33, %c0_34] : memref<16x32xf32, #tpu.memory_space<vmem>>, vector<16x32xf32>
    %cst_35 = arith.constant dense<0.000000e+00> : vector<8x32xf32>
    %75 = tpu.matmul %73, %74, %cst_35 {dimension_numbers = #tpu.dot_dimension_numbers<[1], [0], [0], [1], [0, 0, 1, 1], [], []>} : vector<8x16xf32>, vector<16x32xf32>, vector<8x32xf32> -> vector<8x32xf32>
    %c0_36 = arith.constant 0 : index
    %c0_37 = arith.constant 0 : index
    %76 = vector.load %arg11[%c0_36, %c0_37] : memref<8x32xf32, #tpu.memory_space<vmem>>, vector<8x32xf32>
    tpu.vector_store %arg11[%c0_36, %c0_37], %75 {strides = array<i32>} : memref<8x32xf32, #tpu.memory_space<vmem>>, vector<8x32xf32>,
    return
  }
  func.func @transform_0(%arg0: i32) -> (i32, i32) {
    %c0_i32 = arith.constant 0 : i32
    %c0_i32_0 = arith.constant 0 : i32
    return %arg0, %c0_i32 : i32, i32
  }
  func.func @transform_1(%arg0: i32) -> (i32, i32) {
    %c0_i32 = arith.constant 0 : i32
    %c0_i32_0 = arith.constant 0 : i32
    return %arg0, %c0_i32 : i32, i32
  }
  func.func @transform_2(%arg0: i32) -> (i32, i32) {
    %c0_i32 = arith.constant 0 : i32
    %c0_i32_0 = arith.constant 0 : i32
    %c0_i32_1 = arith.constant 0 : i32
    return %c0_i32, %c0_i32_0 : i32, i32
  }
  func.func @transform_3(%arg0: i32) -> (i32, i32) {
    %c0_i32 = arith.constant 0 : i32
    %c0_i32_0 = arith.constant 0 : i32
    %c0_i32_1 = arith.constant 0 : i32
    return %c0_i32, %c0_i32_0 : i32, i32
  }
  func.func @transform_4(%arg0: i32) -> (i32, i32) {
    %c0_i32 = arith.constant 0 : i32
    %c0_i32_0 = arith.constant 0 : i32
    %c0_i32_1 = arith.constant 0 : i32
    return %c0_i32, %c0_i32_0 : i32, i32
  }
  func.func @transform_5(%arg0: i32) -> (i32, i32) {
    %c0_i32 = arith.constant 0 : i32
    %c0_i32_0 = arith.constant 0 : i32
    %c0_i32_1 = arith.constant 0 : i32
    return %c0_i32, %c0_i32_0 : i32, i32
  }
  func.func @transform_6(%arg0: i32) -> (i32, i32) {
    %c0_i32 = arith.constant 0 : i32
    %c0_i32_0 = arith.constant 0 : i32
    %c0_i32_1 = arith.constant 0 : i32
    return %c0_i32, %c0_i32_0 : i32, i32
  }
  func.func @transform_7(%arg0: i32) -> i32 {
    %c0_i32 = arith.constant 0 : i32
    %c0_i32_0 = arith.constant 0 : i32
    return %c0_i32 : i32
  }
  func.func @transform_8(%arg0: i32) -> (i32, i32) {
    %c0_i32 = arith.constant 0 : i32
    %c0_i32_0 = arith.constant 0 : i32
    return %arg0, %c0_i32 : i32, i32
  }
  func.func @transform_9(%arg0: i32) -> (i32, i32) {
    %c0_i32 = arith.constant 0 : i32
    %c0_i32_0 = arith.constant 0 : i32
    return %arg0, %c0_i32 : i32, i32
  }
  func.func @transform_10(%arg0: i32) -> (i32, i32) {
    %c0_i32 = arith.constant 0 : i32
    %c0_i32_0 = arith.constant 0 : i32
    return %arg0, %c0_i32 : i32, i32
  }
}

</mosaic_0001>

<bundles_post_ra>
// kernel: tpu_custom_call.1
= control target key start
LH: loop header
LB: loop body
LE: loop exit
PB: predicated region body
PF: predicated region fallthrough
CT: control target
= control target key end

     0   :  { %17 = vsyncpa [#allocation4], 0  ;;  %v977_v2 = vmov 0   ;;  %s1221_s0 = inlined_call_operand.vmem [shape: s32[16,1], index: 0, kind: input, shape index: {}]   ;;  %s1222_s1 = inlined_call_operand.vmem [shape: s32[64,1], index: 1, kind: input, shape index: {}]   ;;  %s1223_s2 = inlined_call_operand.vmem [shape: f32[16,32], index: 2, kind: input, shape index: {}]   ;;  %s1224_s3 = inlined_call_operand.vmem [shape: f32[1,16], index: 3, kind: input, shape index: {}]   ;;  %s1225_s4 = inlined_call_operand.vmem [shape: f32[32,32], index: 4, kind: input, shape index: {}]   ;;  %s1226_s5 = inlined_call_operand.vmem [shape: f32[32,16], index: 5, kind: input, shape index: {}]   ;;  %s1227_s6 = inlined_call_operand.vmem [shape: f32[16,32], index: 6, kind: input, shape index: {}]   ;;  %s1228_s7 = inlined_call_operand.<no memory space> [shape: f32[1], index: 7, kind: input, shape index: {}]   ;;  %s1229_s8 = inlined_call_operand.hbm [shape: f32[2,32], index: 8, kind: output, shape index: {0}]   ;;  %s1230_s9 = inlined_call_operand.hbm [shape: f32[2,32], index: 9, kind: output, shape index: {1}]   ;;  %s1231_s10 = inlined_call_operand.hbm [shape: f32[8,32], index: 10, kind: output, shape index: {2}]  }
   0x1   :  { %v35_v0 = vld [vmem:[%s1221_s0] sm:$0xff]  ;;  %v1045_v1 = vld [vmem:[%s1223_s2 + $0x8] sm:$0xff]  ;;  %891 = vset.pattern.permute.xlu0 %v977_v2 }
   0x2   :  { %841 = vmatprep.subr.mxu0 %v1045_v1  ;;  %v1051_v3 = vld [vmem:[%s1223_s2] sm:$0xff] }
   0x3   :  { %18 = vsyncpa [#allocation6], 0  ;;  %40 = vperm.xlu0 %891, %v35_v0   ;;  %842 = vmatpush3.msra.mxu0 %v1045_v1  ;;  %v36_v4 = vld [vmem:[%s1221_s0 + $0x8] sm:$0xff]  ;;  %v978_v5 = vmov 0.0   ;;  %v37_v6 = vlaneseq  ;;  %vm53_vm0 = vcmask 130048   ;;  %v204_v17 = vld [vmem:[%s1225_s4 + $0x18] sm:$0xff] }
   0x4   :  { %843 = vmatprep.subr.mxu0 %v1051_v3  ;;  %848 = vmatprep.subr.mxu1 %v978_v5  ;;  %v808_v9 = vld [vmem:[%s1224_s3] ss:$0 sm:$0xff]  ;;  %v203_v18 = vld [vmem:[%s1225_s4 + $0x10] sm:$0xff]  ;;  %v202_v19 = vld [vmem:[%s1225_s4 + $0x8] sm:$0xff]  ;;  %vm979_vm3 = vmmov 0   ;;  %vm186_vm4 = vcmask 261120  }
   0x5   :  { %844 = vmatpush3.msra.mxu0 %v1051_v3  ;;  %892 = vset.pattern.permute.xlu1 %v977_v2  ;;  %v1062_v7 = vand.u32 127, %v37_v6  ;;  %v201_v20 = vld [vmem:[%s1225_s4] sm:$0xff]  ;;  %vm207_vm5 = vcmask 1041409   ;;  %vm543_vm8 = vcmask 254976   ;;  %vm455_vm9 = vcmask 123904  }
   0x6   :  { %859 = vmatprep.subr.mxu0 %v978_v5  ;;  %849 = vmatpush3.msra.mxu1 %v204_v17  ;;  %v980_v17 = vmov 1966171168  }
   0x7   :  { %43 = vperm.xlu0 %891, %v36_v4   ;;  %850 = vmatprep.subr.mxu1 %v978_v5 }
   0x8   :  { %856 = vmatprep.mubr.msk.f32.mxu1 %vm979_vm3, %v978_v5  ;;  %851 = vmatpush3.msra.mxu1 %v203_v18  ;;  %v283_v18 = vunpack.c.l.s4 %v980_v17 }
   0x9   :  { %852 = vmatprep.subr.mxu1 %v978_v5 }
   0xa   :  { %853 = vmatpush3.msra.mxu1 %v202_v19  ;;  %v284_v19 = vunpack.c.0.s8 %v283_v18 }
   0xb   :  { %854 = vmatprep.subr.mxu1 %v978_v5 }
   0xc   :  { %855 = vmatpush3.msra.mxu1 %v201_v20  ;;  %v286_v20 = vshrl.u32 %v37_v6, 7  ;;  %v546_v6 = vld [vmem:[%s1222_s1] sm:$0xff] }
   0xd   :  { %870 = vmatprep.subr.mxu1 %v978_v5 }
  0x7e   :  { %v41_v8 = vpop.permute.xlu0 %40 }
  0x7f   :  { %vm45_vm1 = vcmp.eq.s32.totalorder %v41_v8, %v1062_v7 }
  0x80   :  { %v804_v10 = vsel %vm45_vm1, 1.0, %v978_v5  ;;  %vm678_vm1 = vcmask 1042434  }
  0x81   :  { %845 = vmatprep.mubr.msk.f32.mxu0 %vm53_vm0, %v804_v10  ;;  %v142_v11 = vmul.f32 %v808_v9, %v804_v10 }
  0x82   :  { %v44_v12 = vpop.permute.xlu0 %43 }
  0x83   :  { %vm46_vm2 = vcmp.eq.s32.totalorder %v44_v12, %v1062_v7  ;;  %v144_v13 = vsel %vm53_vm0, %v142_v11, 0.0 }
  0x84   :  { %v805_v14 = vsel %vm46_vm2, 1.0, %v978_v5  ;;  %145 = vadd.xlane.f32.xlu1 %v144_v13  ;;  %vm680_vm2 = vcmask 1043459  }
  0x85   :  { %846 = vmatmul.mubr.msk.f32.vlgmr.msra.gmra.mxu0 %vm53_vm0, %v805_v14  ;;  %v143_v15 = vmul.f32 %v808_v9, %v805_v14 }
  0x86   :  { %867 = vmatprep.mubr.msk.f32.mxu0 %vm979_vm3, %v978_v5 }
  0x87   :  { %v147_v16 = vsel %vm53_vm0, %v143_v15, 0.0 }
  0x88   :  { %148 = vadd.xlane.f32.xlu1 %v147_v16 }
 0x10d   :  { %v146_v21 = vpop.xlane.xlu1 %145 }
 0x10e   :  { %v150_v22 = vrot.slane %v146_v21, 4 }
 0x110   :  { %v151_v23 = vmax.f32 %v146_v21, %v150_v22 }
 0x111   :  { %v149_v24 = vpop.xlane.xlu1 %148 }
 0x112   :  { %v152_v25 = vrot.slane %v151_v23, 2  ;;  %v156_v26 = vrot.slane %v149_v24, 4 }
 0x114   :  { %v153_v27 = vmax.f32 %v151_v23, %v152_v25  ;;  %v157_v28 = vmax.f32 %v149_v24, %v156_v26 }
 0x116   :  { %v154_v29 = vrot.slane %v153_v27, 1  ;;  %v158_v30 = vrot.slane %v157_v28, 2 }
 0x118   :  { %v155_v31 = vmax.f32 %v153_v27, %v154_v29  ;;  %v159_v32 = vmax.f32 %v157_v28, %v158_v30 }
 0x11a   :  { %v162_v33 = vsub.f32 %v146_v21, %v155_v31  ;;  %v160_v34 = vrot.slane %v159_v32, 1  ;;  %v287_v21 = vsub.s32 %v284_v19, %v286_v20 }
 0x11c   :  { %v164_v35 = vmul.f32 1.442695, %v162_v33  ;;  %v161_v36 = vmax.f32 %v159_v32, %v160_v34 }
 0x11e   :  { %893 = vpow2.f32 %v164_v35  ;;  %v163_v37 = vsub.f32 %v149_v24, %v161_v36  ;;  %v306_v24 = vsub.s32 0, %v286_v20  ;;  %v548_v35 = vld [vmem:[%s1222_s1 + $0x10] sm:$0xff]  ;;  %v547_v36 = vld [vmem:[%s1222_s1 + $0x8] sm:$0xff] }
 0x120   :  { %v166_v38 = vmul.f32 1.442695, %v163_v37  ;;  %v549_v37 = vld [vmem:[%s1222_s1 + $0x18] sm:$0xff] }
 0x122   :  { %895 = vpow2.f32 %v166_v38  ;;  %v379_v38 = vld [vmem:[%s1226_s5 + $0x18] sm:$0xff] }
 0x123   :  { %860 = vmatpush3.msra.mxu0 %v379_v38 }
 0x124   :  { %861 = vmatprep.subr.mxu0 %v978_v5 }
 0x12b   :  { %v894_v39 = vpop.eup %893 }
 0x12c   :  { %v168_v40 = vrot.slane %v894_v39, 4 }
 0x12e   :  { %v169_v41 = vadd.f32 %v894_v39, %v168_v40  ;;  %v377_v40 = vld [vmem:[%s1226_s5 + $0x8] sm:$0xff] }
 0x12f   :  { %v896_v42 = vpop.eup %895 }
 0x130   :  { %v174_v43 = vrot.slane %v896_v42, 4  ;;  %v170_v44 = vrot.slane %v169_v41, 2 }
 0x132   :  { %v175_v45 = vadd.f32 %v896_v42, %v174_v43  ;;  %v171_v46 = vadd.f32 %v170_v44, %v169_v41  ;;  %v376_v41 = vld [vmem:[%s1226_s5] sm:$0xff] }
 0x134   :  { %v176_v47 = vrot.slane %v175_v45, 2  ;;  %v172_v48 = vrot.slane %v171_v46, 1 }
 0x136   :  { %v177_v49 = vadd.f32 %v176_v47, %v175_v45  ;;  %v173_v50 = vadd.f32 %v172_v48, %v171_v46 }
 0x138   :  { %v178_v51 = vrot.slane %v177_v49, 1  ;;  %897 = vrcp.f32 %v173_v50 }
 0x13a   :  { %v179_v52 = vadd.f32 %v178_v51, %v177_v49 }
 0x13c   :  { %899 = vrcp.f32 %v179_v52 }
 0x145   :  { %v898_v53 = vpop.eup %897  ;;  %v847_v54 = vpop.f32.mrf.mxu0 }
 0x146   :  { %v181_v55 = vmul.f32 %v898_v53, %v894_v39  ;;  %v378_v39 = vld [vmem:[%s1226_s5 + $0x10] sm:$0xff] }
 0x147   :  { %v126_v56 = vpop.f32.mrf.mxu0  ;;  %862 = vmatpush3.msra.mxu0 %v378_v39 }
 0x148   :  { %v1095_v57 = vmul.f32 %v181_v55, %v126_v56  ;;  %863 = vmatprep.subr.mxu0 %v978_v5 }
 0x149   :  { %v900_v58 = vpop.eup %899  ;;  %864 = vmatpush3.msra.mxu0 %v377_v40 }
 0x14a   :  { %v183_v59 = vmul.f32 %v900_v58, %v896_v42  ;;  %v187_v60 = vsel %vm186_vm4, %v1095_v57, 0.0  ;;  %865 = vmatprep.subr.mxu0 %v978_v5  ;;  %v323_v42 = vstv %s1228_s7 }
 0x14b   :  { %v188_v61 = vrot.slane %v187_v60, 4  ;;  %866 = vmatpush3.msra.mxu0 %v376_v41 }
 0x14c   :  { %v1099_v62 = vmul.f32 %v847_v54, %v183_v59  ;;  %877 = vmatprep.subr.mxu0 %v978_v5 }
 0x14d   :  { %v189_v63 = vadd.f32 %v188_v61, %v187_v60 }
 0x14e   :  { %v194_v0 = vsel %vm186_vm4, %v1099_v62, 0.0 }
 0x14f   :  { %v195_v2 = vrot.slane %v194_v0, 4  ;;  %v190_v4 = vrot.slane %v189_v63, 2 }
 0x151   :  { %v196_v8 = vadd.f32 %v195_v2, %v194_v0  ;;  %v191_v9 = vadd.f32 %v190_v4, %v189_v63 }
 0x153   :  { %v197_v10 = vrot.slane %v196_v8, 2  ;;  %v192_v12 = vrot.slane %v191_v9, 1 }
 0x155   :  { %v198_v11 = vadd.f32 %v197_v10, %v196_v8  ;;  %v193_v14 = vadd.f32 %v192_v12, %v191_v9 }
 0x157   :  { %v199_v13 = vrot.slane %v198_v11, 1 }
 0x159   :  { %v200_v15 = vadd.f32 %v199_v13, %v198_v11 }
 0x15b   :  { %v208_v16 = vsel %vm207_vm5, %v200_v15, %v193_v14 }
 0x15c   :  { %857 = vmatmul.mubr.msk.f32.vlgmr.msra.gmra.mxu1 %vm186_vm4, %v208_v16 }
 0x15d   :  { %874 = vmatprep.mubr.msk.f32.mxu1 %vm979_vm3, %v978_v5 }
 0x21c   :  { %v277_v22 = vpop.f32.mrf.mxu1 }
 0x21d   :  { %v288_v23 = vrot.slane %v277_v22, %v287_v21 }
 0x21e   :  { %v858_v25 = vpop.f32.mrf.mxu1 }
 0x21f   :  { %v289_v26 = vcombine.high %v288_v23, %v288_v23  ;;  %v296_v27 = vrot.slane %v288_v23, %v287_v21 }
 0x221   :  { %v303_v28 = vrot.slane %v289_v26, %v287_v21  ;;  %v307_v29 = vrot.slane %v296_v27, %v306_v24 }
 0x223   :  { %v314_v30 = vmul.f32 %v307_v29, %v1095_v57  ;;  %v311_v31 = vrot.slane %v303_v28, %v306_v24 }
 0x225   :  { %v316_v32 = vsel %vm186_vm4, %v314_v30, 0.0  ;;  %v315_v33 = vmul.f32 %v311_v31, %v1099_v62 }
 0x226   :  { %317 = vadd.xlane.f32.xlu0 %v316_v32 }
 0x227   :  { %v319_v34 = vsel %vm186_vm4, %v315_v33, 0.0 }
 0x228   :  { %320 = vadd.xlane.f32.xlu1 %v319_v34 }
 0x239   :  { %555 = vperm.xlu1 %892, %v546_v6  }
 0x23c   :  { %561 = vperm.xlu0 %891, %v548_v35  }
 0x23d   :  { %558 = vperm.xlu1 %892, %v547_v36  }
 0x241   :  { %564 = vperm.xlu1 %892, %v549_v37  }
 0x2af   :  { %v318_v43 = vpop.xlane.xlu0 %317 }
 0x2b0   :  { %v324_v44 = vadd.f32 %v323_v42, %v318_v43 }
 0x2b1   :  { %v321_v45 = vpop.xlane.xlu1 %320 }
 0x2b2   :  { %v326_v46 = vrot.slane %v324_v44, 4  ;;  %v325_v47 = vadd.f32 %v323_v42, %v321_v45 }
 0x2b4   :  { %v327_v48 = vmax.f32 %v324_v44, %v326_v46  ;;  %v332_v49 = vrot.slane %v325_v47, 4 }
 0x2b5   :  { %v556_v50 = vpop.permute.xlu1 %555 }
 0x2b6   :  { %v328_v51 = vrot.slane %v327_v48, 2  ;;  %v333_v52 = vmax.f32 %v325_v47, %v332_v49  ;;  %vm578_vm6 = vcmp.eq.s32.totalorder %v556_v50, %v1062_v7 }
 0x2b7   :  { %v812_v53 = vsel %vm578_vm6, 1.0, %v978_v5  ;;  %vm686_vm6 = vcmask 1046534  }
 0x2b8   :  { %v329_v54 = vmax.f32 %v327_v48, %v328_v51  ;;  %v334_v55 = vrot.slane %v333_v52, 2  ;;  %v602_v56 = vsel %vm53_vm0, %v812_v53, 0.0 }
 0x2b9   :  { %v603_v58 = vrot.slane %v602_v56, 4  ;;  %v559_v59 = vpop.permute.xlu1 %558 }
 0x2ba   :  { %v330_v60 = vrot.slane %v329_v54, 1  ;;  %v335_v61 = vmax.f32 %v333_v52, %v334_v55  ;;  %vm579_vm7 = vcmp.eq.s32.totalorder %v559_v59, %v1062_v7 }
 0x2bb   :  { %v604_v63 = vadd.f32 %v603_v58, %v602_v56  ;;  %v813_v0 = vsel %vm579_vm7, 1.0, %v978_v5  ;;  %vm688_vm7 = vcmask 1047559  }
 0x2bc   :  { %v331_v2 = vmax.f32 %v329_v54, %v330_v60  ;;  %v336_v4 = vrot.slane %v335_v61, 1  ;;  %v609_v8 = vsel %vm53_vm0, %v813_v0, 0.0  ;;  %v550_v0 = vld [vmem:[%s1222_s1 + $0x20] sm:$0xff] }
 0x2bd   :  { %v605_v9 = vrot.slane %v604_v63, 2  ;;  %v610_v10 = vrot.slane %v609_v8, 4 }
 0x2be   :  { %v338_v11 = vsub.f32 %v324_v44, %v331_v2  ;;  %v337_v12 = vmax.f32 %v335_v61, %v336_v4  ;;  %v565_v2 = vpop.permute.xlu1 %564 }
 0x2bf   :  { %v606_v13 = vadd.f32 %v605_v9, %v604_v63  ;;  %v611_v14 = vadd.f32 %v610_v10, %v609_v8  ;;  %vm581_vm10 = vcmp.eq.s32.totalorder %v565_v2, %v1062_v7 }
 0x2c0   :  { %v340_v15 = vmul.f32 1.442695, %v338_v11  ;;  %v339_v16 = vsub.f32 %v325_v47, %v337_v12  ;;  %v553_v12 = vld [vmem:[%s1222_s1 + $0x38] sm:$0xff] }
 0x2c1   :  { %v607_v17 = vrot.slane %v606_v13, 1  ;;  %v612_v18 = vrot.slane %v611_v14, 2 }
 0x2c2   :  { %901 = vpow2.f32 %v340_v15  ;;  %v342_v19 = vmul.f32 1.442695, %v339_v16 }
 0x2c3   :  { %v608_v20 = vadd.f32 %v607_v17, %v606_v13  ;;  %v613_v21 = vadd.f32 %v612_v18, %v611_v14  ;;  %v468_v13 = vld [vmem:[%s1227_s6 + $0x8] sm:$0xff]  ;;  %v467_v14 = vld [vmem:[%s1227_s6] sm:$0xff]  ;;  %v562_v17 = vpop.permute.xlu0 %561 }
 0x2c4   :  { %903 = vpow2.f32 %v342_v19  ;;  %871 = vmatpush3.msra.mxu1 %v468_v13  ;;  %vm580_vm11 = vcmp.eq.s32.totalorder %v562_v17, %v1062_v7  ;;  %v815_v19 = vsel %vm581_vm10, 1.0, %v978_v5 }
 0x2c5   :  { %v614_v22 = vrot.slane %v613_v21, 1  ;;  %v659_v23 = vmul.f32 0.125, %v608_v20  ;;  %872 = vmatprep.subr.mxu1 %v978_v5  ;;  %v814_v20 = vsel %vm580_vm11, 1.0, %v978_v5 }
 0x2c6   :  { %873 = vmatpush3.msra.mxu1 %v467_v14 }
 0x2c7   :  { %v615_v24 = vadd.f32 %v614_v22, %v613_v21 }
 0x2c9   :  { %v660_v25 = vmul.f32 0.125, %v615_v24 }
 0x2cb   :  { %v1150_v26 = vsel %vm207_vm5, %v660_v25, %v659_v23  ;;  %v623_v23 = vsel %vm53_vm0, %v815_v19, 0.0  ;;  %v616_v25 = vsel %vm53_vm0, %v814_v20, 0.0 }
 0x2cf   :  { %v902_v27 = vpop.eup %901 }
 0x2d0   :  { %v344_v28 = vrot.slane %v902_v27, 4 }
 0x2d1   :  { %v904_v29 = vpop.eup %903 }
 0x2d2   :  { %v345_v30 = vadd.f32 %v902_v27, %v344_v28  ;;  %v350_v31 = vrot.slane %v904_v29, 4 }
 0x2d4   :  { %v351_v32 = vadd.f32 %v904_v29, %v350_v31  ;;  %v346_v33 = vrot.slane %v345_v30, 2  ;;  %v617_v31 = vrot.slane %v616_v25, 4 }
 0x2d6   :  { %v347_v34 = vadd.f32 %v346_v33, %v345_v30  ;;  %v352_v6 = vrot.slane %v351_v32, 2 }
 0x2d8   :  { %v348_v35 = vrot.slane %v347_v34, 1  ;;  %v353_v36 = vadd.f32 %v352_v6, %v351_v32 }
 0x2da   :  { %v349_v37 = vadd.f32 %v348_v35, %v347_v34  ;;  %v354_v38 = vrot.slane %v353_v36, 1  ;;  %v618_v35 = vadd.f32 %v617_v31, %v616_v25 }
 0x2dc   :  { %v355_v39 = vadd.f32 %v354_v38, %v353_v36  ;;  %905 = vrcp.f32 %v349_v37 }
 0x2de   :  { %907 = vrcp.f32 %v355_v39 }
 0x2e9   :  { %v906_v40 = vpop.eup %905 }
 0x2ea   :  { %v357_v41 = vmul.f32 %v906_v40, %v902_v27  ;;  %v619_v40 = vrot.slane %v618_v35, 2 }
 0x2eb   :  { %v908_v42 = vpop.eup %907 }
 0x2ec   :  { %v359_v43 = vmul.f32 %v908_v42, %v904_v29  ;;  %v360_v44 = vmul.f32 %v357_v41, %v1095_v57  ;;  %v624_v29 = vrot.slane %v623_v23, 4 }
 0x2ee   :  { %v361_v45 = vmul.f32 %v359_v43, %v1099_v62  ;;  %v362_v46 = vsel %vm186_vm4, %v360_v44, 0.0  ;;  %v625_v6 = vadd.f32 %v624_v29, %v623_v23 }
 0x2ef   :  { %v363_v47 = vrot.slane %v362_v46, 4 }
 0x2f0   :  { %v369_v48 = vsel %vm186_vm4, %v361_v45, 0.0  ;;  %v626_v39 = vrot.slane %v625_v6, 2 }
 0x2f1   :  { %v364_v49 = vadd.f32 %v363_v47, %v362_v46  ;;  %v370_v50 = vrot.slane %v369_v48, 4  ;;  %v620_v46 = vadd.f32 %v619_v40, %v618_v35 }
 0x2f2   :  { %v627_v45 = vadd.f32 %v626_v39, %v625_v6 }
 0x2f3   :  { %v365_v51 = vrot.slane %v364_v49, 2  ;;  %v371_v52 = vadd.f32 %v370_v50, %v369_v48 }
 0x2f5   :  { %v366_v53 = vadd.f32 %v365_v51, %v364_v49  ;;  %v372_v54 = vrot.slane %v371_v52, 2  ;;  %v628_v51 = vrot.slane %v627_v45, 1 }
 0x2f7   :  { %v367_v55 = vrot.slane %v366_v53, 1  ;;  %v373_v56 = vadd.f32 %v372_v54, %v371_v52 }
 0x2f9   :  { %v374_v58 = vrot.slane %v373_v56, 1  ;;  %v368_v59 = vadd.f32 %v367_v55, %v366_v53  ;;  %v621_v53 = vrot.slane %v620_v46, 1 }
 0x2fb   :  { %v375_v60 = vadd.f32 %v374_v58, %v373_v56 }
 0x2fd   :  { %v382_v57 = vsel %vm207_vm5, %v375_v60, %v368_v59  ;;  %v629_v60 = vadd.f32 %v628_v51, %v627_v45  ;;  %vm684_vm5 = vcmask 1045509  }
 0x2fe   :  { %868 = vmatmul.mubr.msk.f32.vlgmr.msra.gmra.mxu0 %vm186_vm4, %v382_v57  ;;  %544 = vst.msk [vmem:[#allocation3] sm:$0x3] %vm543_vm8, %v382_v57 }
 0x2ff   :  { %878 = vmatpush3.msra.mxu0 %v1045_v1  ;;  %881 = vmatprep.mubr.msk.f32.mxu0 %vm979_vm3, %v978_v5  ;;  %v551_v1 = vld [vmem:[%s1222_s1 + $0x28] sm:$0xff]  ;;  %vm682_vm3 = vcmask 1044484  }
 0x300   :  { %879 = vmatprep.subr.mxu0 %v978_v5 }
 0x301   :  { %880 = vmatpush3.msra.mxu0 %v1051_v3  ;;  %v552_v3 = vld [vmem:[%s1222_s1 + $0x30] sm:$0xff]  ;;  %s981_s1 = smov [#allocation3]  }
 0x302   :  { %s769_s6 = sshll.u32 %s981_s1, 4  ;;  %s770_s6 = int_to_ptr.vmem [resolvable:$true] %s769_s6 }
 0x303   :  { %s913_s11 = scalar_lea.vmem %s770_s6, 32  ;;  %p918_p1 = scmp.lt.s32.totalorder %s770_s6, %s770_s6 }
 0x304   :  { %p914_p0 = scmp.ne.s32.totalorder %s770_s6, %s913_s11  ;;  %p919_p2 = scmp.lt.s32.totalorder %s913_s11, %s913_s11 }
 0x306   :  { %p920_p3 = por %p919_p2, %p918_p1 }
 0x308   :  { %p921_p4 = pnand %p920_p3, %p914_p0 }
 0x3be   :  { %v451_v62 = vpop.f32.mrf.mxu0 }
 0x3bf   :  { %v456_v61 = vsel %vm455_vm9, %v451_v62, -inf }
 0x3c0   :  { %457 = vmax.xlane.f32.xlu1 %v456_v61  ;;  %v869_v63 = vpop.f32.mrf.mxu0 }
 0x3d1   :  { %567 = vperm.xlu1 %892, %v550_v0  }
 0x3d5   :  { %570 = vperm.xlu1 %892, %v551_v1  }
 0x3d9   :  { %573 = vperm.xlu1 %892, %v552_v3  }
 0x449   :  { %v458_v4 = vpop.xlane.xlu1 %457 }
 0x44a   :  { %v459_v8 = vsub.f32 %v451_v62, %v458_v4  ;;  %v622_v62 = vadd.f32 %v621_v53, %v620_v46 }
 0x44c   :  { %v460_v9 = vmul.f32 1.442695, %v459_v8  ;;  %v661_v4 = vmul.f32 0.125, %v622_v62 }
 0x44d   :  { %v568_v15 = vpop.permute.xlu1 %567 }
 0x44e   :  { %909 = vpow2.f32 %v460_v9  ;;  %vm582_vm12 = vcmp.eq.s32.totalorder %v568_v15, %v1062_v7 }
 0x44f   :  { %v816_v21 = vsel %vm582_vm12, 1.0, %v978_v5 }
 0x450   :  { %v630_v27 = vsel %vm53_vm0, %v816_v21, 0.0 }
 0x451   :  { %v571_v16 = vpop.permute.xlu1 %570  ;;  %v631_v32 = vrot.slane %v630_v27, 4 }
 0x452   :  { %vm583_vm13 = vcmp.eq.s32.totalorder %v571_v16, %v1062_v7 }
 0x453   :  { %v817_v22 = vsel %vm583_vm13, 1.0, %v978_v5  ;;  %v632_v36 = vadd.f32 %v631_v32, %v630_v27 }
 0x454   :  { %v637_v28 = vsel %vm53_vm0, %v817_v22, 0.0 }
 0x455   :  { %v574_v18 = vpop.permute.xlu1 %573  ;;  %v638_v33 = vrot.slane %v637_v28, 4  ;;  %v633_v41 = vrot.slane %v632_v36, 2 }
 0x456   :  { %vm584_vm14 = vcmp.eq.s32.totalorder %v574_v18, %v1062_v7 }
 0x457   :  { %v818_v24 = vsel %vm584_vm14, 1.0, %v978_v5  ;;  %v639_v37 = vadd.f32 %v638_v33, %v637_v28  ;;  %v634_v47 = vadd.f32 %v633_v41, %v632_v36 }
 0x458   :  { %v644_v30 = vsel %vm53_vm0, %v818_v24, 0.0 }
 0x459   :  { %v645_v34 = vrot.slane %v644_v30, 4  ;;  %v640_v42 = vrot.slane %v639_v37, 2  ;;  %v635_v54 = vrot.slane %v634_v47, 1 }
 0x45b   :  { %v1174_v10 = vpop.eup %909  ;;  %v646_v38 = vadd.f32 %v645_v34, %v644_v30  ;;  %v641_v48 = vadd.f32 %v640_v42, %v639_v37  ;;  %v636_v61 = vadd.f32 %v635_v54, %v634_v47 }
 0x45c   :  { %v462_v11 = vsel %vm455_vm9, %v1174_v10, 0.0 }
 0x45d   :  { %463 = vadd.xlane.f32.xlu1 %v462_v11  ;;  %v647_v44 = vrot.slane %v646_v38, 2  ;;  %v642_v56 = vrot.slane %v641_v48, 1 }
 0x45f   :  { %v648_v50 = vadd.f32 %v647_v44, %v646_v38  ;;  %v643_v63 = vadd.f32 %v642_v56, %v641_v48 }
 0x461   :  { %v649_v59 = vrot.slane %v648_v50, 1  ;;  %v664_v9 = vmul.f32 0.125, %v643_v63 }
 0x463   :  { %v650_v1 = vadd.f32 %v649_v59, %v648_v50 }
 0x465   :  { %v665_v13 = vmul.f32 0.125, %v650_v1 }
 0x46e   :  { %576 = vperm.xlu1 %892, %v553_v12   ;;  %v679_v12 = vsel %vm678_vm1, %v661_v4, %v1150_v26 }
 0x4e6   :  { %v464_v43 = vpop.xlane.xlu1 %463 }
 0x4e7   :  { %911 = vrcp.f32 %v464_v43 }
 0x4ea   :  { %v577_v49 = vpop.permute.xlu1 %576 }
 0x4eb   :  { %vm585_vm15 = vcmp.eq.s32.totalorder %v577_v49, %v1062_v7  ;;  %v662_v7 = vmul.f32 0.125, %v629_v60 }
 0x4ec   :  { %v819_v52 = vsel %vm585_vm15, 1.0, %v978_v5  ;;  %v663_v5 = vmul.f32 0.125, %v636_v61 }
 0x4ed   :  { %v651_v55 = vsel %vm53_vm0, %v819_v52, 0.0  ;;  %v681_v14 = vsel %vm680_vm2, %v662_v7, %v679_v12 }
 0x4ee   :  { %v652_v58 = vrot.slane %v651_v55, 4  ;;  %v683_v16 = vsel %vm682_vm3, %v663_v5, %v681_v14 }
 0x4ef   :  { %v685_v18 = vsel %vm684_vm5, %v664_v9, %v683_v16 }
 0x4f0   :  { %v653_v57 = vadd.f32 %v652_v58, %v651_v55  ;;  %v687_v19 = vsel %vm686_vm6, %v665_v13, %v685_v18 }
 0x4f2   :  { %v654_v0 = vrot.slane %v653_v57, 2 }
 0x4f4   :  { %v912_v3 = vpop.eup %911  ;;  %v655_v2 = vadd.f32 %v654_v0, %v653_v57 }
 0x4f5   :  { %v466_v8 = vmul.f32 %v912_v3, %v1174_v10 }
 0x4f6   :  { %v656_v11 = vrot.slane %v655_v2, 1 }
 0x4f7   :  { %875 = vmatmul.mubr.msk.f32.vlgmr.msra.gmra.mxu1 %vm53_vm0, %v466_v8 }
 0x4f8   :  { %v657_v15 = vadd.f32 %v656_v11, %v655_v2 }
 0x4fa   :  { %v666_v17 = vmul.f32 0.125, %v657_v15 }
 0x4fc   :  { %v689_v20 = vsel %vm688_vm7, %v666_v17, %v687_v19 }
 0x4fd   :  { %882 = vmatmul.mubr.msk.f32.vlgmr.msra.gmra.mxu0 %vm53_vm0, %v689_v20 }
 0x4fe   :  { %924 = shalt.err (!%p921_p4)
}
 0x4ff   :  { %772 = dma.vmem_to_hbm [thread:$0]  %s770_s6, 32, %s1229_s8, [#allocation4]  }
 0x500   :  { %s982_s14 = smov [#allocation5]   ;;  %s983_s16 = smov [#allocation7]  }
 0x501   :  { %s779_s15 = sshll.u32 %s982_s14, 4  ;;  %s789_s17 = sshll.u32 %s983_s16, 4  ;;  %s780_s15 = int_to_ptr.vmem [resolvable:$true] %s779_s15  ;;  %s790_s17 = int_to_ptr.vmem [resolvable:$true] %s789_s17 }
 0x502   :  { %s933_s18 = scalar_lea.vmem %s780_s15, 32  ;;  %p938_p6 = scmp.lt.s32.totalorder %s780_s15, %s780_s15 }
 0x503   :  { %p934_p5 = scmp.ne.s32.totalorder %s780_s15, %s933_s18  ;;  %p939_p7 = scmp.lt.s32.totalorder %s933_s18, %s933_s18 }
 0x505   :  { %p940_p8 = por %p939_p7, %p938_p6 }
 0x507   :  { %p941_p9 = pnand %p940_p8, %p934_p5 }
 0x5b7   :  { %v538_v26 = vpop.f32.mrf.mxu1 }
 0x5b8   :  { %545 = vst.msk [vmem:[#allocation5] sm:$0x3] %vm543_vm8, %v538_v26 }
 0x5b9   :  { %v876_v10 = vpop.f32.mrf.mxu1 }
 0x5ba   :  { %944 = shalt.err (!%p941_p9)
}
 0x5bb   :  { %782 = dma.vmem_to_hbm [thread:$0]  %s780_s15, 32, %s1230_s9, [#allocation6]  }
 0x5bc   :  { %s953_s8 = scalar_lea.vmem %s790_s17, 128  ;;  %p958_p11 = scmp.lt.s32.totalorder %s790_s17, %s790_s17 }
 0x5bd   :  { %v758_v21 = vpop.f32.mrf.mxu0  ;;  %p954_p10 = scmp.ne.s32.totalorder %s790_s17, %s953_s8  ;;  %p959_p12 = scmp.lt.s32.totalorder %s953_s8, %s953_s8 }
 0x5be   :  { %762 = vst.msk [vmem:[#allocation7] sm:$0xff] %vm186_vm4, %v758_v21 }
 0x5bf   :  { %v883_v22 = vpop.f32.mrf.mxu0  ;;  %p960_p13 = por %p959_p12, %p958_p11 }
 0x5c1   :  { %p961_p0 = pnand %p960_p13, %p954_p10 }
 0x5c3   :  { %964 = shalt.err (!%p961_p0)
}
 0x5c4   :  { %792 = dma.vmem_to_hbm [thread:$0]  %s790_s17, 128, %s1231_s10, [#allocation6]  }
 0x5c5   :  { %973 = dma.done.wait [#allocation4], 32  }
 0x5c6   :  { %974 = vsyncadd [#allocation4], 4294967264 }
 0x5c7   :  { %975 = dma.done.wait [#allocation6], 160  }
 0x5c8   :  { %976 = vsyncadd [#allocation6], 4294967136 }
 0x5c9   :  { %802 = vsyncpa [#allocation4], 1 }
 0x5ca   :  { %803 = vsyncpa [#allocation6], 1 }

</bundles_post_ra>
